<compile_context>
chip_gen: v7x
topology: tpu7x:2x2x1
jax: 0.10.0
libtpu: 0.0.40
codegen_flags: <defaults>
</compile_context>

<pallas_src>
import functools

import jax
import jax.numpy as jnp
from jax.experimental import pallas as pl
from jax.experimental.pallas import tpu as pltpu


C1 = 8        # encoder level-1 / decoder channels
C2 = 16       # encoder level-2 (bottleneck) channels
IN_PAD = 8    # true input channels (1) zero-padded to 8 for an MXU-friendly K


# ----------------------------------------------------------------------------
# One-time probe: pin down pltpu.roll's rotation convention so the in-kernel
# spatial shifts are direction-correct regardless of the Mosaic convention.
# ----------------------------------------------------------------------------
def _roll_matches_jnp_roll():
    def probe_kernel(x_ref, o_ref):
        o_ref[...] = pltpu.roll(x_ref[...], 1, 1)

    x = jnp.tile(jnp.arange(128, dtype=jnp.float32)[None, :], (8, 1))
    out = pl.pallas_call(
        probe_kernel,
        out_shape=jax.ShapeDtypeStruct((8, 128), jnp.float32),
    )(x)
    # jnp.roll(x, 1) moves old element 0 to index 1.
    return bool(out[0, 1] == 0.0)


# ----------------------------------------------------------------------------
# The fused UNet_2D forward kernel.
# Activations: (C, M) with M = B*H*W flattened in (b, h, w) order (lanes).
# Weights:     (taps, Cout, Cin) bf16;  biases: (Cout, 1) f32.
# ----------------------------------------------------------------------------
def _unet2d_kernel(x_ref,
                   w_e1a, b_e1a, w_e1b, b_e1b,
                   w_e2a, b_e2a, w_e2b, b_e2b,
                   w_up, b_up,
                   w_d1a_up, w_d1a_skip, b_d1a,
                   w_d1b, b_d1b,
                   w_head, b_head,
                   out_ref, *, B, H, W, roll_jnp_like):
    f32, bf16 = jnp.float32, jnp.bfloat16
    M = B * H * W

    # flat (b, h, w) index decomposition (H, W are powers of two -> bit ops).
    lin = jax.lax.broadcasted_iota(jnp.int32, (1, M), 1)
    w_idx = lin & (W - 1)
    h_idx = (lin >> (W.bit_length() - 1)) & (H - 1)

    def shift_src(x, s):
        """y[:, p] = x[:, (p + s) % M]; wrapped lanes are masked by callers."""
        if s % M == 0:
            return x
        amt = (-s) % M if roll_jnp_like else s % M
        return pltpu.roll(x, amt, 1)

    def boundary_masks(step):
        m = {}
        for dh in (-1, 0, 1):
            for dw in (-1, 0, 1):
                hs, ws = h_idx + dh * step, w_idx + dw * step
                m[(dh, dw)] = (hs >= 0) & (hs < H) & (ws >= 0) & (ws < W)
        return m

    masks1 = boundary_masks(1)   # full-resolution taps
    masks2 = boundary_masks(2)   # half-resolution taps (sparse even anchors)

    def conv3x3(x, w_ref, masks, step):
        """x: (Cin, M) f32 -> (Cout, M) f32 pre-activation (no bias)."""
        cout = w_ref.shape[1]
        acc = jnp.zeros((cout, M), f32)
        for kh in range(3):
            for kw in range(3):
                dh, dw = kh - 1, kw - 1
                src = shift_src(x, (dh * W + dw) * step)
                src = jnp.where(masks[(dh, dw)], src, 0.0).astype(bf16)
                acc = acc + jnp.dot(w_ref[kh * 3 + kw], src,
                                    preferred_element_type=f32)
        return acc

    relu = lambda v: jnp.maximum(v, 0.0)

    # ---- encoder level 1 (dense, full resolution) --------------------------
    x0 = x_ref[...].astype(f32)                                   # (8, M)
    e1 = relu(conv3x3(x0, w_e1a, masks1, 1) + b_e1a[...])
    e1 = relu(conv3x3(e1, w_e1b, masks1, 1) + b_e1b[...])         # (C1, M)

    # ---- 2x2 maxpool, kept sparse on even (h, w) anchors (no compaction) ---
    m = jnp.maximum(e1, shift_src(e1, 1))
    m = jnp.maximum(m, shift_src(m, W))
    even = ((h_idx & 1) == 0) & ((w_idx & 1) == 0)
    p1 = jnp.where(even, m, 0.0)                                  # (C1, M)

    # ---- encoder level 2 (half resolution == stride-2 taps on anchors) -----
    e2 = relu(conv3x3(p1, w_e2a, masks2, 2) + b_e2a[...])
    e2 = relu(conv3x3(e2, w_e2b, masks2, 2) + b_e2b[...])         # (C2, M)

    # ---- ConvTranspose2d(C2, C1, kernel=2, stride=2) upsample --------------
    # out[h, w] = W[:, :, h%2, w%2] @ e2[h//2, w//2] + b (scatter by parity).
    e2_bf = e2.astype(bf16)
    up = jnp.zeros((w_up.shape[1], M), f32)
    for a in range(2):
        for b2 in range(2):
            contrib = jnp.dot(w_up[a * 2 + b2], e2_bf,
                              preferred_element_type=f32)
            contrib = shift_src(contrib, -(a * W + b2))
            parity = ((h_idx & 1) == a) & ((w_idx & 1) == b2)
            up = up + jnp.where(parity, contrib, 0.0)
    up = up + b_up[...]                                           # (C1, M)

    # ---- decoder: concat([up, e1]) expressed as a split-weight sum ---------
    d = relu(conv3x3(up, w_d1a_up, masks1, 1)
             + conv3x3(e1, w_d1a_skip, masks1, 1) + b_d1a[...])
    d = relu(conv3x3(d, w_d1b, masks1, 1) + b_d1b[...])           # (C1, M)

    # ---- 1x1 head + clamp(0, 1) (the torch.clamp of UNet_2D.forward) -------
    out = jnp.dot(w_head[...], d.astype(bf16), preferred_element_type=f32)
    out_ref[...] = jnp.clip(out + b_head[...], 0.0, 1.0)


# ----------------------------------------------------------------------------
# Wrapper: NCHW in -> NCHW out, single pallas_call, everything resident in VMEM
# ----------------------------------------------------------------------------
def unet_2d_forward(params, images_nchw, *, roll_jnp_like=True):
    B, cin, H, W = images_nchw.shape
    assert cin == 1, "UNet_2D_2D is built with a single input channel"
    assert H & (H - 1) == 0 and W & (W - 1) == 0, "power-of-two H, W expected"
    M = B * H * W

    x = images_nchw.reshape(1, M).astype(jnp.float32)
    x = jnp.pad(x, ((0, IN_PAD - 1), (0, 0)))          # channel pad 1 -> 8

    args = (x,
            params["e1a_w"], params["e1a_b"], params["e1b_w"], params["e1b_b"],
            params["e2a_w"], params["e2a_b"], params["e2b_w"], params["e2b_b"],
            params["up_w"], params["up_b"],
            params["d1a_w_up"], params["d1a_w_skip"], params["d1a_b"],
            params["d1b_w"], params["d1b_b"],
            params["head_w"], params["head_b"])

    out = pl.pallas_call(
        functools.partial(_unet2d_kernel, B=B, H=H, W=W,
                          roll_jnp_like=roll_jnp_like),
        out_shape=jax.ShapeDtypeStruct((1, M), jnp.float32),
        in_specs=[pl.BlockSpec(memory_space=pltpu.MemorySpace.VMEM)] * len(args),
        out_specs=pl.BlockSpec(memory_space=pltpu.MemorySpace.VMEM),
    )(*args)
    return out.reshape(B, 1, H, W)


# ----------------------------------------------------------------------------
# Deterministic synthetic parameters, pre-cast to bf16 once (outside jit)
# ----------------------------------------------------------------------------
def init_params(c1=C1, c2=C2, in_ch=1, out_ch=1):
    keys = jax.random.split(jax.random.PRNGKey(0), 8)

    def conv_w(k, taps, cout, cin, fan_in):
        w = jax.random.normal(k, (taps, cout, cin), jnp.float32) / (fan_in ** 0.5)
        return w.astype(jnp.bfloat16)

    def bias(c):
        return jnp.zeros((c, 1), jnp.float32)

    p = {}
    # encoder level 1 (true in_ch=1, zero-padded to IN_PAD input channels)
    w0 = jax.random.normal(keys[0], (9, c1, in_ch), jnp.float32) / ((9 * in_ch) ** 0.5)
    p["e1a_w"] = jnp.pad(w0, ((0, 0), (0, 0), (0, IN_PAD - in_ch))).astype(jnp.bfloat16)
    p["e1a_b"] = bias(c1)
    p["e1b_w"] = conv_w(keys[1], 9, c1, c1, 9 * c1); p["e1b_b"] = bias(c1)
    # encoder level 2
    p["e2a_w"] = conv_w(keys[2], 9, c2, c1, 9 * c1); p["e2a_b"] = bias(c2)
    p["e2b_w"] = conv_w(keys[3], 9, c2, c2, 9 * c2); p["e2b_b"] = bias(c2)
    # transposed-conv upsample (upmode='transpose'), taps ordered kh*2 + kw
    p["up_w"] = conv_w(keys[4], 4, c1, c2, c2); p["up_b"] = bias(c1)
    # decoder conv a: input = concat([up, e1]) (joinType='concat') -> split weight
    wd = jax.random.normal(keys[5], (9, c1, 2 * c1), jnp.float32) / ((9 * 2 * c1) ** 0.5)
    p["d1a_w_up"] = wd[:, :, :c1].astype(jnp.bfloat16)
    p["d1a_w_skip"] = wd[:, :, c1:].astype(jnp.bfloat16)
    p["d1a_b"] = bias(c1)
    p["d1b_w"] = conv_w(keys[6], 9, c1, c1, 9 * c1); p["d1b_b"] = bias(c1)
    # 1x1 head
    p["head_w"] = (jax.random.normal(keys[7], (out_ch, c1), jnp.float32)
                   / (c1 ** 0.5)).astype(jnp.bfloat16)
    p["head_b"] = bias(out_ch)
    return p


if __name__ == "__main__":
    # inner UNet_2D_2D is built with 1 input / 1 output channel
    x = jax.random.uniform(jax.random.PRNGKey(0), (2, 1, 16, 16), jnp.float32)
    params = init_params()

    roll_jnp_like = _roll_matches_jnp_roll()
    fwd = jax.jit(functools.partial(unet_2d_forward, params,
                                    roll_jnp_like=roll_jnp_like))
    out = jax.block_until_ready(fwd(x))

    assert out.shape == (2, 1, 16, 16), out.shape
    assert bool(jnp.all(jnp.isfinite(out)))
    assert bool(jnp.all(out >= 0.0)) and bool(jnp.all(out <= 1.0))
    print("KERNEL_OK")
</pallas_src>

<mosaic_0001>
module attributes {stable_mosaic.version = 11 : i64} {
  func.func @probe_kernel(%arg0: memref<8x128xf32, #tpu.memory_space<vmem>>, %arg1: memref<8x128xf32, #tpu.memory_space<vmem>>) attributes {dimension_semantics = [], scalar_prefetch = 0 : i64, scratch_operands = 0 : i64, tpu.core_type = #tpu.core_type<tc>} {
    %c0 = arith.constant 0 : index
    %c0_0 = arith.constant 0 : index
    %0 = vector.load %arg0[%c0, %c0_0] : memref<8x128xf32, #tpu.memory_space<vmem>>, vector<8x128xf32>
    %c1_i32 = arith.constant 1 : i32
    %1 = tpu.dynamic_rotate %0 by %c1_i32 dim 1 : vector<8x128xf32>, i32 -> vector<8x128xf32>
    %c0_1 = arith.constant 0 : index
    %c0_2 = arith.constant 0 : index
    %2 = vector.load %arg1[%c0_1, %c0_2] : memref<8x128xf32, #tpu.memory_space<vmem>>, vector<8x128xf32>
    tpu.vector_store %arg1[%c0_1, %c0_2], %1 {strides = array<i32>} : memref<8x128xf32, #tpu.memory_space<vmem>>, vector<8x128xf32>,
    return
  }
}

</mosaic_0001>

<bundles_post_ra>
// kernel: tpu_custom_call.1
= control target key start
LH: loop header
LB: loop body
LE: loop exit
PB: predicated region body
PF: predicated region fallthrough
CT: control target
= control target key end

     0   :  { %6 = vsyncpa [#allocation3], 0  ;;  %s128_s0 = inlined_call_operand.hbm [shape: f32[8,128], index: 0, kind: input, shape index: {}]   ;;  %s129_s1 = inlined_call_operand.hbm [shape: f32[8,128], index: 1, kind: output, shape index: {}]  }
   0x1   :  { %7 = vsyncpa [#allocation4], 0  ;;  %s91_s6 = smov [#allocation2]   ;;  %s43_s10 = scalar_lea.hbm %s128_s0, 128 }
   0x2   :  { %s14_s7 = sshll.u32 %s91_s6, 4  ;;  %p44_p0 = scmp.ne.s32.totalorder %s128_s0, %s43_s10  ;;  %s15_s7 = int_to_ptr.vmem [resolvable:$true] %s14_s7 }
   0x3   :  { %p47_p1 = scmp.lt.u32.totalorder %s43_s10, %s128_s0 }
   0x5   :  { %p49_p2 = pnand %p47_p1, %p44_p0 }
   0x7   :  { %52 = shalt.err (!%p49_p2)
}
   0x8   :  { %s53_s15 = scalar_lea.vmem %s15_s7, 128  ;;  %p58_p4 = scmp.lt.s32.totalorder %s15_s7, %s15_s7 }
   0x9   :  { %p54_p3 = scmp.ne.s32.totalorder %s15_s7, %s53_s15  ;;  %p59_p5 = scmp.lt.s32.totalorder %s53_s15, %s53_s15 }
   0xb   :  { %p60_p6 = por %p59_p5, %p58_p4 }
   0xd   :  { %p61_p7 = pnand %p60_p6, %p54_p3 }
   0xf   :  { %64 = shalt.err (!%p61_p7)
}
  0x10   :  { %17 = dma.hbm_to_vmem [thread:$0]  %s128_s0, 128, %s15_s7, [#allocation3]  }
  0x11   :  { %87 = dma.done.wait [#allocation3], 128  }
  0x12   :  { %88 = vsyncadd [#allocation3], 4294967168  ;;  %v21_v0 = vld [vmem:[#allocation2] sm:$0xff]  ;;  %s92_s18 = smov 1   ;;  %s93_s19 = smov [#allocation5]  }
  0x13   :  { %22 = vrot.lane.b32.xlu0 %v21_v0, %s92_s18  ;;  %s31_s20 = sshll.u32 %s93_s19, 4  ;;  %s32_s20 = int_to_ptr.vmem [resolvable:$true] %s31_s20 }
  0x14   :  { %s65_s21 = scalar_lea.vmem %s32_s20, 128  ;;  %p70_p9 = scmp.lt.s32.totalorder %s32_s20, %s32_s20 }
  0x15   :  { %p66_p8 = scmp.ne.s32.totalorder %s32_s20, %s65_s21  ;;  %p71_p10 = scmp.lt.s32.totalorder %s65_s21, %s65_s21 }
  0x17   :  { %p72_p11 = por %p71_p10, %p70_p9 }
  0x19   :  { %p73_p12 = pnand %p72_p11, %p66_p8 }
  0x85   :  { %v23_v1 = vpop.permute.xlu0 %22 }
  0x86   :  { %24 = vst [vmem:[#allocation5] sm:$0xff] %v23_v1 }
  0x87   :  { %76 = shalt.err (!%p73_p12)
}
  0x88   :  { %s77_s0 = scalar_lea.hbm %s129_s1, 128 }
  0x89   :  { %p78_p13 = scmp.ne.s32.totalorder %s129_s1, %s77_s0  ;;  %p81_p0 = scmp.lt.u32.totalorder %s77_s0, %s129_s1 }
  0x8b   :  { %p83_p1 = pnand %p81_p0, %p78_p13 }
  0x8d   :  { %86 = shalt.err (!%p83_p1)
}
  0x8e   :  { %34 = dma.vmem_to_hbm [thread:$0]  %s32_s20, 128, %s129_s1, [#allocation4]  }
  0x8f   :  { %89 = dma.done.wait [#allocation4], 128  }
  0x90   :  { %90 = vsyncadd [#allocation4], 4294967168 }
  0x91   :  { %38 = vsyncpa [#allocation3], 1 }
  0x92   :  { %39 = vsyncpa [#allocation4], 1 }

</bundles_post_ra>
